<compile_context>
chip_gen: v7x
topology: tpu7x:2x2x1
jax: 0.10.0
libtpu: 0.0.40
codegen_flags: <defaults>
</compile_context>

<pallas_src>
import functools

import jax
import jax.numpy as jnp
from jax.experimental import pallas as pl
from jax.experimental.pallas import tpu as pltpu


def _round_up(x, m):
    return ((x + m - 1) // m) * m


def gating_kernel(fp, x_ref, w_ref, b_ref, bh_ref, out_ref):
    """One fused matmul per row tile + per-row 2-way softmax gate.

    x_ref  : (TM, 3F)    [Q | K | V] row tile
    w_ref  : (3F, 5*fp)  block-diagonal fused weight; lane-aligned col groups:
                         [ q | k1 | k2 | v1@wh_folded | v2@wh_folded ]
    b_ref  : (1, 5*fp)   fused bias row (zero in padded columns)
    bh_ref : (1, fp)     output-projection bias, zero padded to fp lanes
    out_ref: (TM, fp)    lane-dense output tile (cols >= F are zero)
    """
    proj = (jnp.dot(x_ref[...], w_ref[...], preferred_element_type=jnp.float32)
            + b_ref[...])

    q = proj[:, 0 * fp:1 * fp]
    k1 = proj[:, 1 * fp:2 * fp]
    k2 = proj[:, 2 * fp:3 * fp]
    v1 = proj[:, 3 * fp:4 * fp]
    v2 = proj[:, 4 * fp:5 * fp]

    # Per-row 2-way softmax gate; padded columns are exact zeros -> no effect.
    s1 = jnp.sum(q * k1, axis=-1, keepdims=True)
    s2 = jnp.sum(q * k2, axis=-1, keepdims=True)
    m = jnp.maximum(s1, s2)
    e1 = jnp.exp(s1 - m)
    e2 = jnp.exp(s2 - m)
    inv = pl.reciprocal(e1 + e2, approx=False)

    out_ref[...] = (e1 * inv) * v1 + (e2 * inv) * v2 + bh_ref[...]


def prepare_gating_params(params, heads):
    """One-time wrapper-side algebra: fold heads + lh, build fused weights."""
    F = params["wq"].shape[0]
    d_h = F // heads
    fp = _round_up(F, 128)          # lane-dense group width
    kx = 3 * F

    # All heads share one set of Linear layers -> cat over heads followed by
    # lh collapses to a single (d_h, F) matrix (sum of lh's per-head row blocks),
    # which is then folded into the value projections (g1 + g2 == 1).
    wh_folded = params["wh"].reshape(heads, d_h, F).sum(axis=0)      # (d_h, F)
    wv1f = params["wv1"] @ wh_folded                                 # (F, F)
    wv2f = params["wv2"] @ wh_folded
    bv1f = params["bv1"] @ wh_folded                                 # (1, F)
    bv2f = params["bv2"] @ wh_folded

    W = jnp.zeros((kx, 5 * fp), jnp.float32)
    W = W.at[0:F,         0 * fp:0 * fp + d_h].set(params["wq"])
    W = W.at[F:2 * F,     1 * fp:1 * fp + d_h].set(params["wk1"])
    W = W.at[2 * F:3 * F, 2 * fp:2 * fp + d_h].set(params["wk2"])
    W = W.at[F:2 * F,     3 * fp:3 * fp + F].set(wv1f)
    W = W.at[2 * F:3 * F, 4 * fp:4 * fp + F].set(wv2f)

    b = jnp.zeros((1, 5 * fp), jnp.float32)
    b = b.at[:, 0 * fp:0 * fp + d_h].set(params["bq"])
    b = b.at[:, 1 * fp:1 * fp + d_h].set(params["bk1"])
    b = b.at[:, 2 * fp:2 * fp + d_h].set(params["bk2"])
    b = b.at[:, 3 * fp:3 * fp + F].set(bv1f)
    b = b.at[:, 4 * fp:4 * fp + F].set(bv2f)

    bh = jnp.zeros((1, fp), jnp.float32).at[:, :F].set(params["bh"])

    return {"W": W, "b": b, "bh": bh, "fp": fp, "F": F}


def gating(Q, K, V, fused, *, tm=1024):
    """Fused Gating forward. Q, K, V: (B, F) float32. Returns (B, F)."""
    B, F = Q.shape
    assert F == fused["F"]
    fp = fused["fp"]

    X = jnp.concatenate([Q, K, V], axis=1)               # (B, 3F) one stream

    # Row tile: as large as possible but keep >=2 grid steps so v7x's two
    # TensorCores both get work; on v5e/v6e two fat steps cost ~0.35 us extra.
    B8 = _round_up(B, 8)
    half = _round_up((B8 + 1) // 2, 8)
    TM = max(8, min(_round_up(tm, 8), half))
    Bp = _round_up(B, TM)
    if Bp != B:
        X = jnp.pad(X, ((0, Bp - B), (0, 0)))
    grid = (Bp // TM,)

    kx = X.shape[1]
    row_in = pl.BlockSpec((TM, kx), lambda i: (i, 0))
    row_out = pl.BlockSpec((TM, fp), lambda i: (i, 0))
    w_spec = pl.BlockSpec(fused["W"].shape, lambda i: (0, 0))
    b_spec = pl.BlockSpec(fused["b"].shape, lambda i: (0, 0))
    bh_spec = pl.BlockSpec(fused["bh"].shape, lambda i: (0, 0))

    # VMEM budget: double-buffered row tiles + resident weights + headroom for
    # the (TM, 5*fp) projection intermediate; capped at 32 MiB (v7x-safe).
    tile_bytes = (TM * kx + TM * fp) * 4 * 2
    proj_bytes = TM * 5 * fp * 4 * 2
    weight_bytes = int(fused["W"].size + fused["b"].size + fused["bh"].size) * 4 * 2
    vmem_limit = int(min(32 * 1024 * 1024,
                         max(16 * 1024 * 1024,
                             tile_bytes + proj_bytes + weight_bytes)))

    out = pl.pallas_call(
        functools.partial(gating_kernel, fp),
        out_shape=jax.ShapeDtypeStruct((Bp, fp), jnp.float32),
        grid_spec=pltpu.PrefetchScalarGridSpec(
            num_scalar_prefetch=0,
            grid=grid,
            in_specs=[row_in, w_spec, b_spec, bh_spec],
            out_specs=row_out),
        compiler_params=pltpu.CompilerParams(
            dimension_semantics=("parallel",),
            vmem_limit_bytes=vmem_limit),
    )(X, fused["W"], fused["b"], fused["bh"])
    return out[:B, :F]


# -------------------- pure-JAX reference (faithful to PyTorch) --------------
def gating_reference(Q, K, V, p, heads):
    outs = []
    for _ in range(heads):
        q = Q @ p["wq"] + p["bq"]
        k1 = K @ p["wk1"] + p["bk1"]
        k2 = V @ p["wk2"] + p["bk2"]
        v1 = K @ p["wv1"] + p["bv1"]
        v2 = V @ p["wv2"] + p["bv2"]
        s1 = jnp.sum(q * k1, axis=1, keepdims=True)
        s2 = jnp.sum(q * k2, axis=1, keepdims=True)
        m = jnp.maximum(s1, s2)
        e1 = jnp.exp(s1 - m)
        e2 = jnp.exp(s2 - m)
        g1 = e1 / (e1 + e2)
        g2 = e2 / (e1 + e2)
        outs.append(g1 * v1 + g2 * v2)
    concat = jnp.concatenate(outs, axis=-1)
    return concat @ p["wh"] + p["bh"]


if __name__ == "__main__":
    heads, in_feature = 4, 32
    batch = 256
    d_h = in_feature // heads

    key = jax.random.PRNGKey(0)
    ks = jax.random.split(key, 16)

    def winit(k, shape, scale=0.2):
        return scale * jax.random.normal(k, shape, dtype=jnp.float32)

    Q = jax.random.normal(ks[0], (batch, in_feature), dtype=jnp.float32)
    K = jax.random.normal(ks[1], (batch, in_feature), dtype=jnp.float32)
    V = jax.random.normal(ks[2], (batch, in_feature), dtype=jnp.float32)

    params = {
        "wq":  winit(ks[3],  (in_feature, d_h)), "bq":  winit(ks[4],  (1, d_h), 0.05),
        "wk1": winit(ks[5],  (in_feature, d_h)), "bk1": winit(ks[6],  (1, d_h), 0.05),
        "wk2": winit(ks[7],  (in_feature, d_h)), "bk2": winit(ks[8],  (1, d_h), 0.05),
        "wv1": winit(ks[9],  (in_feature, d_h)), "bv1": winit(ks[10], (1, d_h), 0.05),
        "wv2": winit(ks[11], (in_feature, d_h)), "bv2": winit(ks[12], (1, d_h), 0.05),
        "wh":  winit(ks[13], (in_feature, in_feature)),
        "bh":  winit(ks[14], (1, in_feature), 0.05),
    }

    fused = prepare_gating_params(params, heads)   # one-time folding/fusion
    out = gating(Q, K, V, fused, heads=None) if False else gating(Q, K, V, fused)
    out = jax.block_until_ready(out)

    ref = gating_reference(Q, K, V, params, heads)
    assert out.shape == (batch, in_feature), "shape mismatch"
    assert jnp.allclose(out, ref, atol=1e-3, rtol=1e-3), "output mismatch"

    print("KERNEL_OK")
</pallas_src>

<mosaic_0001>
module attributes {stable_mosaic.version = 11 : i64} {
  func.func @gating_kernel(%arg0: i32, %arg1: memref<128x96xf32, #tpu.memory_space<vmem>>, %arg2: memref<96x640xf32, #tpu.memory_space<vmem>>, %arg3: memref<1x640xf32, #tpu.memory_space<vmem>>, %arg4: memref<1x128xf32, #tpu.memory_space<vmem>>, %arg5: memref<128x128xf32, #tpu.memory_space<vmem>>) attributes {dimension_semantics = [#tpu.dimension_semantics<parallel>], iteration_bounds = array<i64: 2>, scalar_prefetch = 0 : i64, scratch_operands = 0 : i64, tpu.core_type = #tpu.core_type<tc>, window_params = [{transform_indices = @transform_0, window_bounds = array<i64: 128, 96>}, {pipeline_mode = #tpu.pipeline_mode<synchronous>, transform_indices = @transform_1, window_bounds = array<i64: 96, 640>}, {pipeline_mode = #tpu.pipeline_mode<synchronous>, transform_indices = @transform_2, window_bounds = array<i64: 1, 640>}, {pipeline_mode = #tpu.pipeline_mode<synchronous>, transform_indices = @transform_3, window_bounds = array<i64: 1, 128>}, {transform_indices = @transform_4, window_bounds = array<i64: 128, 128>}]} {
    %c0 = arith.constant 0 : index
    %c0_0 = arith.constant 0 : index
    %0 = vector.load %arg1[%c0, %c0_0] : memref<128x96xf32, #tpu.memory_space<vmem>>, vector<128x96xf32>
    %c0_1 = arith.constant 0 : index
    %c0_2 = arith.constant 0 : index
    %1 = vector.load %arg2[%c0_1, %c0_2] : memref<96x640xf32, #tpu.memory_space<vmem>>, vector<96x640xf32>
    %cst = arith.constant dense<0.000000e+00> : vector<128x640xf32>
    %2 = tpu.matmul %0, %1, %cst {dimension_numbers = #tpu.dot_dimension_numbers<[1], [0], [0], [1], [0, 0, 1, 1], [], []>} : vector<128x96xf32>, vector<96x640xf32>, vector<128x640xf32> -> vector<128x640xf32>
    %c0_3 = arith.constant 0 : index
    %c0_4 = arith.constant 0 : index
    %3 = vector.load %arg3[%c0_3, %c0_4] : memref<1x640xf32, #tpu.memory_space<vmem>>, vector<1x640xf32>
    %4 = vector.broadcast %3 : vector<1x640xf32> to vector<128x640xf32>
    %5 = arith.addf %2, %4 : vector<128x640xf32>
    %6 = vector.extract_strided_slice %5 {offsets = [0, 0], sizes = [128, 128], strides = [1, 1]} : vector<128x640xf32> to vector<128x128xf32>
    %7 = vector.extract_strided_slice %5 {offsets = [0, 128], sizes = [128, 128], strides = [1, 1]} : vector<128x640xf32> to vector<128x128xf32>
    %8 = vector.extract_strided_slice %5 {offsets = [0, 256], sizes = [128, 128], strides = [1, 1]} : vector<128x640xf32> to vector<128x128xf32>
    %9 = vector.extract_strided_slice %5 {offsets = [0, 384], sizes = [128, 128], strides = [1, 1]} : vector<128x640xf32> to vector<128x128xf32>
    %10 = vector.extract_strided_slice %5 {offsets = [0, 512], sizes = [128, 128], strides = [1, 1]} : vector<128x640xf32> to vector<128x128xf32>
    %11 = arith.mulf %6, %7 : vector<128x128xf32>
    %cst_5 = arith.constant dense<0.000000e+00> : vector<128xf32>
    %12 = vector.multi_reduction <add>, %11, %cst_5 [1] : vector<128x128xf32> to vector<128xf32>
    %13 = vector.shape_cast %12 : vector<128xf32> to vector<128x1xf32>
    %14 = arith.mulf %6, %8 : vector<128x128xf32>
    %cst_6 = arith.constant dense<0.000000e+00> : vector<128xf32>
    %15 = vector.multi_reduction <add>, %14, %cst_6 [1] : vector<128x128xf32> to vector<128xf32>
    %16 = vector.shape_cast %15 : vector<128xf32> to vector<128x1xf32>
    %17 = arith.maximumf %13, %16 : vector<128x1xf32>
    %18 = arith.subf %13, %17 : vector<128x1xf32>
    %19 = math.exp %18 : vector<128x1xf32>
    %20 = arith.subf %16, %17 : vector<128x1xf32>
    %21 = math.exp %20 : vector<128x1xf32>
    %22 = arith.addf %19, %21 : vector<128x1xf32>
    %23 = tpu.reciprocal %22 : vector<128x1xf32> -> vector<128x1xf32>
    %24 = arith.mulf %19, %23 : vector<128x1xf32>
    %25 = vector.broadcast %24 : vector<128x1xf32> to vector<128x128xf32>
    %26 = arith.mulf %25, %9 : vector<128x128xf32>
    %27 = arith.mulf %21, %23 : vector<128x1xf32>
    %28 = vector.broadcast %27 : vector<128x1xf32> to vector<128x128xf32>
    %29 = arith.mulf %28, %10 : vector<128x128xf32>
    %30 = arith.addf %26, %29 : vector<128x128xf32>
    %c0_7 = arith.constant 0 : index
    %c0_8 = arith.constant 0 : index
    %31 = vector.load %arg4[%c0_7, %c0_8] : memref<1x128xf32, #tpu.memory_space<vmem>>, vector<1x128xf32>
    %32 = vector.broadcast %31 : vector<1x128xf32> to vector<128x128xf32>
    %33 = arith.addf %30, %32 : vector<128x128xf32>
    %c0_9 = arith.constant 0 : index
    %c0_10 = arith.constant 0 : index
    %34 = vector.load %arg5[%c0_9, %c0_10] : memref<128x128xf32, #tpu.memory_space<vmem>>, vector<128x128xf32>
    tpu.vector_store %arg5[%c0_9, %c0_10], %33 {strides = array<i32>} : memref<128x128xf32, #tpu.memory_space<vmem>>, vector<128x128xf32>,
    return
  }
  func.func @transform_0(%arg0: i32) -> (i32, i32) {
    %c0_i32 = arith.constant 0 : i32
    %c0_i32_0 = arith.constant 0 : i32
    return %arg0, %c0_i32 : i32, i32
  }
  func.func @transform_1(%arg0: i32) -> (i32, i32) {
    %c0_i32 = arith.constant 0 : i32
    %c0_i32_0 = arith.constant 0 : i32
    %c0_i32_1 = arith.constant 0 : i32
    return %c0_i32, %c0_i32_0 : i32, i32
  }
  func.func @transform_2(%arg0: i32) -> (i32, i32) {
    %c0_i32 = arith.constant 0 : i32
    %c0_i32_0 = arith.constant 0 : i32
    %c0_i32_1 = arith.constant 0 : i32
    return %c0_i32, %c0_i32_0 : i32, i32
  }
  func.func @transform_3(%arg0: i32) -> (i32, i32) {
    %c0_i32 = arith.constant 0 : i32
    %c0_i32_0 = arith.constant 0 : i32
    %c0_i32_1 = arith.constant 0 : i32
    return %c0_i32, %c0_i32_0 : i32, i32
  }
  func.func @transform_4(%arg0: i32) -> (i32, i32) {
    %c0_i32 = arith.constant 0 : i32
    %c0_i32_0 = arith.constant 0 : i32
    return %arg0, %c0_i32 : i32, i32
  }
}

</mosaic_0001>

<bundles_post_ra>
// kernel: tpu_custom_call.1
= control target key start
LH: loop header
LB: loop body
LE: loop exit
PB: predicated region body
PF: predicated region fallthrough
CT: control target
= control target key end

     0   :  { %9 = vsyncpa [#allocation3], 0  ;;  %s2417_s0 = inlined_call_operand.vmem [shape: f32[256,96], index: 0, kind: input, shape index: {}]   ;;  %s2418_s1 = inlined_call_operand.hbm [shape: f32[96,640], index: 1, kind: input, shape index: {}]   ;;  %s2419_s2 = inlined_call_operand.vmem [shape: f32[1,640], index: 2, kind: input, shape index: {}]   ;;  %s2420_s3 = inlined_call_operand.vmem [shape: f32[1,128], index: 3, kind: input, shape index: {}]   ;;  %s2421_s4 = inlined_call_operand.hbm [shape: f32[256,128], index: 4, kind: output, shape index: {}]  }
   0x1   :  { %10 = vsyncpa [#allocation4], 0 }
   0x2   :  { %12 = vsyncpa [#allocation4 + $0x1], 0  ;;  %s1783_s15 = smov 0   ;;  %s1785_s16 = smov 0  }
   0x3   :  { %s1787_s17 = smov 0   ;;  %s1789_s18 = smov 0  }
   0x4 LB: > { %s1804_s19 = sadd.s32 4294967295, %s1749_s18   ;;  %s1280_s20 = sadd.s32 4294967294, %s1749_s18   ;;  %s1749_s18 = sphi %s1789_s18, %s2438_s18   ;;  %s1745_s17 = sphi %s1787_s17, %s2437_s17   ;;  %s1741_s16 = sphi %s1785_s16, %s2436_s16   ;;  %s1737_s15 = sphi %s1783_s15, %s2435_s15  }
   0x5   : > { %s1808_s21 = sadd.s32 1, %s1749_s18   ;;  %s114_s22 = sadd.s32 1, %s1745_s17 }
   0x6   : > { %s111_s23 = ssub.s32 %s1749_s18, %s1808_s21  ;;  %p124_p0 = scmp.ne.s32.totalorder %s1745_s17, %s1741_s16 }
   0x7   : > { %p112_p1 = scmp.eq.s32.totalorder %s111_s23, 0  ;;  %p125_p2 = scmp.eq.s32.totalorder %s1804_s19, 1 }
   0x8   : > { %p130_p3 = scmp.ne.s32.totalorder %s1741_s16, %s1737_s15  ;;  %p131_p4 = scmp.eq.s32.totalorder %s1280_s20, 1 }
   0x9   : > { %s1819_s24 = scalar_select %p112_p1, %s1745_s17, %s114_s22  }
   0xa   : > { %p1821_p5 = por %p125_p2, %p124_p0  ;;  %p1825_p6 = por %p131_p4, %p130_p3 }
   0xb   : > { %p1281_p7 = scmp.ge.s32.totalorder %s1749_s18, 1  ;;  %p138_p8 = scmp.lt.s32.totalorder %s1749_s18, 3 }
   0xc   : > { %s2425_s25 = scalar_select %p1821_p5, 1, 0 }
   0xd   : > { %s2426_s26 = scalar_select %p1825_p6, 1, 0 }
   0xe   : > { %p2422_p9 = scmp.eq.s32.totalorder %s1804_s19, 0  ;;  %p1832_p10 = pnand %p1281_p7, %p138_p8 }
   0xf   : > { %s1751_s28 = smov [#allocation2]   ;;  %s1655_s7 = scalar_lea.hbm %s2418_s1, 7680 }
  0x10   : > { %s2427_s27 = scalar_select %p1832_p10, 1, 0 }
  0x11   : > { %s150_s29 = sshll.u32 %s1751_s28, 4  ;;  %p1510_p11 = pneg %p1832_p10  ;;  %s151_s29 = int_to_ptr.vmem [resolvable:$true] %s150_s29 }
  0x12   : > { %p1656_p13 = scmp.ne.s32.totalorder %s2418_s1, %s1655_s7  ;;  %p1662_p3 = scmp.lt.u32.totalorder %s1655_s7, %s2418_s1 }
  0x13   : > { %p1840_p12 = pnand %p2422_p9, %p1510_p11 }
  0x15   : > { %p1657_p0 = pneg %p1840_p12 }
  0x17   : > { %p1658_p1 = pnand %p1657_p0, %p1656_p13 }
  0x19   : > { %p1659_p2 = pneg %p1658_p1 }
  0x1b   : > { %p1664_p4 = pnand %p1662_p3, %p1659_p2 }
  0x1d   : > { %1667 = shalt.err (!%p1664_p4)
}
  0x1e   : > { %s1668_s12 = scalar_lea.vmem %s151_s29, 7680  ;;  %p1676_p9 = scmp.lt.s32.totalorder %s151_s29, %s151_s29 }
  0x1f   : > { %p1669_p7 = scmp.ne.s32.totalorder %s151_s29, %s1668_s12  ;;  %p1677_p6 = scmp.lt.s32.totalorder %s1668_s12, %s1668_s12 }
  0x21   : > { %p1671_p8 = pnand %p1669_p7, %p1657_p0  ;;  %p1678_p5 = por %p1677_p6, %p1676_p9 }
  0x23   : > { %p1672_p11 = pneg %p1671_p8 }
  0x25   : > { %p1679_p10 = pnand %p1678_p5, %p1672_p11 }
  0x27   : > { %1682 = shalt.err (!%p1679_p10)
}
  0x28   : > { %s1752_s13 = smov 640   ;;  %s1753_s14 = smov 40  }
  0x29   : > { %1513 = dma.hbm_to_vmem [thread:$0]  (!%p1840_p12), %s2418_s1, 7680, %s151_s29, [#allocation3], %s1752_s13, %s1752_s13, %s1753_s14  }
  0x2a   : > { %p2429_p13 = scmp.ne.s32.totalorder %s2427_s27, 0 }
  0x2b   : > { %p2430_p1 = scmp.eq.s32.totalorder (!%p2429_p13), %s1804_s19, 0 }
  0x2c   : > { %181 = sbr.rel (%p2429_p13) target bundleno = 557 (0x22d), region = 36 }
  0x33   : > { %1728 = dma.done.wait (%p2430_p1), [#allocation3], 7680   ;;  %p2431_p0 = pmov %p2430_p1 }
  0x34   : > { %v1754_v0 = vmov 0.0   ;;  %v231_v1 = vld [vmem:[#allocation2 + $0x8] sm:$0xff]  ;;  %v236_v2 = vld [vmem:[#allocation2 + $0x30] sm:$0xff]  ;;  %v233_v3 = vld [vmem:[#allocation2 + $0x18] sm:$0xff]  ;;  %s1287_s23 = sshll.u32 %s1804_s19, 4  ;;  %vm317_vm0 = vcmask 785408  }
  0x35   : > { %1730 = vsyncadd (%p2431_p0), [#allocation3], 4294959616  ;;  %430 = vmatprep.mubr.f32.mxu0 %v1754_v0  ;;  %591 = vmatprep.mubr.f32.mxu1 %v1754_v0  ;;  %v1420_v4 = vpack.c.bf16 %v236_v2, %v231_v1  ;;  %v238_v5 = vld [vmem:[#allocation2 + $0x40] sm:$0xff]  ;;  %v235_v7 = vld [vmem:[#allocation2 + $0x28] sm:$0xff]  ;;  %p1871_p5 = scmp.lt.s32.totalorder %s1287_s23, 31  ;;  %s204_s8 = sand.u32 1, %s1741_s16  }
  0x36   : > { %v230_v6 = vld [vmem:[#allocation2] sm:$0xff]  ;;  %v1444_v8 = vpack.c.bf16 %v238_v5, %v233_v3  ;;  %v232_v10 = vld [vmem:[#allocation2 + $0x10] sm:$0xff]  ;;  %v237_v11 = vld [vmem:[#allocation2 + $0x38] sm:$0xff]  ;;  %s2210_s9 = sshll.u32 %s204_s8, 7  ;;  %s1343_s13 = sshll.u32 %s1804_s19, 11 }
  0x37   : > { %v1422_v9 = vpack.c.bf16 %v235_v7, %v230_v6  ;;  %v241_v12 = vld [vmem:[#allocation2 + $0x58] sm:$0xff]  ;;  %1421 = vmatprep.subr.bf16.mxu0 %v1420_v4  ;;  %v1446_v13 = vpack.c.bf16 %v237_v11, %v232_v10  ;;  %v246_v14 = vld [vmem:[#allocation2 + $0x80] sm:$0xff]  ;;  %v243_v15 = vld [vmem:[#allocation2 + $0x68] sm:$0xff]  ;;  %s2440_s23 = smov (!%p1871_p5, %s1287_s23), 31  ;;  %s2233_s12 = scalar_lea.vmem [#allocation5], %s2210_s9 }
  0x38   : > { %v248_v16 = vld [vmem:[#allocation2 + $0x90] sm:$0xff]  ;;  %1445 = vmatprep.subr.bf16.mxu1 %v1444_v8  ;;  %v1424_v17 = vpack.c.bf16 %v246_v14, %v241_v12  ;;  %v245_v20 = vld [vmem:[#allocation2 + $0x78] sm:$0xff]  ;;  %v242_v21 = vld [vmem:[#allocation2 + $0x60] sm:$0xff]  ;;  %s1288_s28 = sshll.u32 %s2440_s23, 3  ;;  %s1206_s14 = sshll.u32 %s2233_s12, 4  ;;  %s2370_s14 = int_to_ptr.vmem [resolvable:$true] %s1206_s14 }
  0x39   : > { %1423 = vmatpush1.bf16.msra.mxu0 %v1422_v9  ;;  %v1448_v18 = vpack.c.bf16 %v248_v16, %v243_v15  ;;  %v240_v19 = vld [vmem:[#allocation2 + $0x50] sm:$0xff]  ;;  %1447 = vmatpush1.bf16.msra.mxu1 %v1446_v13  ;;  %v247_v23 = vld [vmem:[#allocation2 + $0x88] sm:$0xff]  ;;  %v253_v28 = vld [vmem:[#allocation2 + $0xb8] sm:$0xff]  ;;  %s1882_s5 = scalar_lea.vmem %s2417_s0, %s1288_s28  ;;  %s2368_s23 = scalar_lea.hbm %s2421_s4, %s1343_s13 }
  0x3a   : > { %v1426_v22 = vpack.c.bf16 %v245_v20, %v240_v19  ;;  %v251_v24 = vld [vmem:[#allocation2 + $0xa8] sm:$0xff]  ;;  %v256_v25 = vld [vmem:[#allocation2 + $0xd0] sm:$0xff]  ;;  %1425 = vmatprep.subr.bf16.mxu0 %v1424_v17  ;;  %v1450_v26 = vpack.c.bf16 %v247_v23, %v242_v21  ;;  %v258_v29 = vld [vmem:[#allocation2 + $0xe0] sm:$0xff]  ;;  %s2376_s27 = scalar_lea.sflag [#allocation4], %s204_s8  ;;  %s1683_s19 = scalar_lea.vmem %s2370_s14, 2048 }
  0x3b   : > { %1449 = vmatprep.subr.bf16.mxu1 %v1448_v18  ;;  %v1428_v27 = vpack.c.bf16 %v256_v25, %v251_v24  ;;  %v250_v30 = vld [vmem:[#allocation2 + $0xa0] sm:$0xff]  ;;  %v1452_v31 = vpack.c.bf16 %v258_v29, %v253_v28  ;;  %v255_v32 = vld [vmem:[#allocation2 + $0xc8] sm:$0xff]  ;;  %v252_v33 = vld [vmem:[#allocation2 + $0xb0] sm:$0xff]  ;;  %p1684_p6 = scmp.ne.s32.totalorder %s2370_s14, %s1683_s19  ;;  %p2433_p9 = scmp.ne.s32.totalorder %s2425_s25, 0 }
  0x3c   : > { %v257_v34 = vld [vmem:[#allocation2 + $0xd8] sm:$0xff]  ;;  %v1430_v35 = vpack.c.bf16 %v255_v32, %v250_v30  ;;  %v266_v37 = vld [vmem:[#allocation2 + $0x120] sm:$0xff]  ;;  %v263_v38 = vld [vmem:[#allocation2 + $0x108] sm:$0xff]  ;;  %s1755_s28 = smov [#allocation5]  }
  0x3d   : > { %1427 = vmatpush1.bf16.msra.mxu0 %v1426_v22  ;;  %v261_v36 = vld [vmem:[#allocation2 + $0xf8] sm:$0xff]  ;;  %1451 = vmatpush1.bf16.msra.mxu1 %v1450_v26  ;;  %v1454_v39 = vpack.c.bf16 %v257_v34, %v252_v33  ;;  %v268_v41 = vld [vmem:[#allocation2 + $0x130] sm:$0xff]  ;;  %v262_v45 = vld [vmem:[#allocation2 + $0x100] sm:$0xff]  ;;  %p1685_p10 = pnand %p1684_p6, %p2433_p9  ;;  %s1687_s29 = sshll.u32 %s1755_s28, 4  ;;  %s1688_s29 = int_to_ptr.vmem [resolvable:$false] %s1687_s29 }
  0x3e   : > { %1429 = vmatprep.subr.bf16.mxu0 %v1428_v27  ;;  %v1432_v40 = vpack.c.bf16 %v266_v37, %v261_v36  ;;  %v260_v42 = vld [vmem:[#allocation2 + $0xf0] sm:$0xff]  ;;  %v265_v43 = vld [vmem:[#allocation2 + $0x118] sm:$0xff]  ;;  %1453 = vmatprep.subr.bf16.mxu1 %v1452_v31  ;;  %v1456_v44 = vpack.c.bf16 %v268_v41, %v263_v38  ;;  %v267_v46 = vld [vmem:[#allocation2 + $0x128] sm:$0xff]  ;;  %s1689_s30 = scalar_lea.vmem %s1688_s29, 4096  ;;  %p1690_p2 = scmp.lt.s32.totalorder %s2370_s14, %s1688_s29 }
  0x3f   : > { %v271_v47 = vld [vmem:[#allocation2 + $0x148] sm:$0xff]  ;;  %v276_v48 = vld [vmem:[#allocation2 + $0x170] sm:$0xff]  ;;  %v273_v49 = vld [vmem:[#allocation2 + $0x158] sm:$0xff]  ;;  %v1434_v51 = vpack.c.bf16 %v265_v43, %v260_v42  ;;  %v1458_v52 = vpack.c.bf16 %v267_v46, %v262_v45  ;;  %p1686_p12 = pneg %p1685_p10  ;;  %p1691_p3 = scmp.lt.s32.totalorder %s1689_s30, %s1683_s19 }
  0x40   : > { %v278_v50 = vld [vmem:[#allocation2 + $0x180] sm:$0xff]  ;;  %v1436_v53 = vpack.c.bf16 %v276_v48, %v271_v47  ;;  %v275_v55 = vld [vmem:[#allocation2 + $0x168] sm:$0xff]  ;;  %v272_v56 = vld [vmem:[#allocation2 + $0x150] sm:$0xff] }
  0x41   : > { %1431 = vmatpush1.bf16.msra.mxu0 %v1430_v35  ;;  %1455 = vmatpush1.bf16.msra.mxu1 %v1454_v39  ;;  %v270_v54 = vld [vmem:[#allocation2 + $0x140] sm:$0xff]  ;;  %v1460_v57 = vpack.c.bf16 %v278_v50, %v273_v49  ;;  %v277_v58 = vld [vmem:[#allocation2 + $0x178] sm:$0xff]  ;;  %v283_v61 = vld [vmem:[#allocation2 + $0x1a8] sm:$0xff]  ;;  %p1692_p4 = por %p1691_p3, %p1690_p2 }
  0x42   : > { %1433 = vmatprep.subr.bf16.mxu0 %v1432_v40  ;;  %1457 = vmatprep.subr.bf16.mxu1 %v1456_v44  ;;  %v281_v59 = vld [vmem:[#allocation2 + $0x198] sm:$0xff]  ;;  %v286_v60 = vld [vmem:[#allocation2 + $0x1c0] sm:$0xff]  ;;  %v288_v62 = vld [vmem:[#allocation2 + $0x1d0] sm:$0xff]  ;;  %v1438_v63 = vpack.c.bf16 %v275_v55, %v270_v54  ;;  %v1462_v1 = vpack.c.bf16 %v277_v58, %v272_v56 }
  0x43   : > { %v1440_v2 = vpack.c.bf16 %v286_v60, %v281_v59  ;;  %v280_v3 = vld [vmem:[#allocation2 + $0x190] sm:$0xff]  ;;  %v285_v4 = vld [vmem:[#allocation2 + $0x1b8] sm:$0xff]  ;;  %v1464_v5 = vpack.c.bf16 %v288_v62, %v283_v61  ;;  %v282_v6 = vld [vmem:[#allocation2 + $0x1a0] sm:$0xff]  ;;  %p1693_p7 = pnand %p1692_p4, %p1686_p12 }
  0x44   : > { %v287_v7 = vld [vmem:[#allocation2 + $0x1c8] sm:$0xff]  ;;  %v1442_v8 = vpack.c.bf16 %v285_v4, %v280_v3  ;;  %v234_v10 = vld [vmem:[#allocation2 + $0x20] sm:$0xff]  ;;  %v244_v13 = vld [vmem:[#allocation2 + $0x70] sm:$0xff] }
  0x45   : > { %1435 = vmatpush1.bf16.msra.mxu0 %v1434_v51  ;;  %1459 = vmatpush1.bf16.msra.mxu1 %v1458_v52  ;;  %v1466_v9 = vpack.c.bf16 %v287_v7, %v282_v6  ;;  %v239_v11 = vld [vmem:[#allocation2 + $0x48] sm:$0xff]  ;;  %v249_v14 = vld [vmem:[#allocation2 + $0x98] sm:$0xff]  ;;  %v1885_v15 = vld [vmem:[%s1882_s5] sm:$0xff] }
  0x46   : > { %1437 = vmatprep.subr.bf16.mxu0 %v1436_v53  ;;  %1461 = vmatprep.subr.bf16.mxu1 %v1460_v57  ;;  %v1468_v12 = vpack.c.bf16 %v239_v11, %v234_v10  ;;  %v1472_v16 = vpack.c.bf16 %v249_v14, %v244_v13  ;;  %v254_v17 = vld [vmem:[#allocation2 + $0xc0] sm:$0xff]  ;;  %v259_v18 = vld [vmem:[#allocation2 + $0xe8] sm:$0xff]  ;;  %v264_v21 = vld [vmem:[#allocation2 + $0x110] sm:$0xff] }
  0x47   : > { %v1893_v19 = vld [vmem:[%s1882_s5 + $0x8] sm:$0xff]  ;;  %v1476_v20 = vpack.c.bf16 %v259_v18, %v254_v17  ;;  %v269_v22 = vld [vmem:[#allocation2 + $0x138] sm:$0xff]  ;;  %v1902_v23 = vld [vmem:[%s1882_s5 + $0x10] sm:$0xff] }
  0x48   : > { %v1480_v24 = vpack.c.bf16 %v269_v22, %v264_v21  ;;  %v274_v25 = vld [vmem:[#allocation2 + $0x160] sm:$0xff]  ;;  %v279_v26 = vld [vmem:[#allocation2 + $0x188] sm:$0xff]  ;;  %v1911_v27 = vld [vmem:[%s1882_s5 + $0x18] sm:$0xff] }
  0x49   : > { %1439 = vmatpush1.bf16.msra.mxu0 %v1438_v63  ;;  %1463 = vmatpush1.bf16.msra.mxu1 %v1462_v1  ;;  %v1484_v28 = vpack.c.bf16 %v279_v26, %v274_v25  ;;  %v284_v29 = vld [vmem:[#allocation2 + $0x1b0] sm:$0xff]  ;;  %v289_v30 = vld [vmem:[#allocation2 + $0x1d8] sm:$0xff]  ;;  %v1920_v31 = vld [vmem:[%s1882_s5 + $0x20] sm:$0xff] }
  0x4a   : > { %1441 = vmatprep.subr.bf16.mxu0 %v1440_v2  ;;  %1465 = vmatprep.subr.bf16.mxu1 %v1464_v5  ;;  %v1488_v32 = vpack.c.bf16 %v289_v30, %v284_v29  ;;  %v1929_v33 = vld [vmem:[%s1882_s5 + $0x28] sm:$0xff]  ;;  %v220_v34 = vld [vmem:[%s1882_s5 + $0x30] sm:$0xff]  ;;  %v221_v35 = vld [vmem:[%s1882_s5 + $0x38] sm:$0xff] }
  0x4b   : > { %v222_v36 = vld [vmem:[%s1882_s5 + $0x40] sm:$0xff]  ;;  %v223_v37 = vld [vmem:[%s1882_s5 + $0x48] sm:$0xff]  ;;  %v224_v38 = vld [vmem:[%s1882_s5 + $0x50] sm:$0xff] }
  0x4c   : > { %v225_v39 = vld [vmem:[%s1882_s5 + $0x58] sm:$0xff]  ;;  %v226_v40 = vld [vmem:[%s1882_s5 + $0x60] sm:$0xff]  ;;  %v227_v41 = vld [vmem:[%s1882_s5 + $0x68] sm:$0xff] }
  0x4d   : > { %1443 = vmatpush1.bf16.msra.mxu0 %v1442_v8  ;;  %1467 = vmatpush1.bf16.msra.mxu1 %v1466_v9  ;;  %v228_v42 = vld [vmem:[%s1882_s5 + $0x70] sm:$0xff]  ;;  %v229_v43 = vld [vmem:[%s1882_s5 + $0x78] sm:$0xff]  ;;  %v2014_v46 = vld [vmem:[%s2419_s2] sm:$0x1f] }
  0x4e   : > { %1469 = vmatprep.subr.bf16.mxu0 %v1468_v12  ;;  %1492 = vmatprep.subr.bf16.mxu1 %v1468_v12 }
  0x50   : > { %1289 = vmatmul.mubr.msk.f32.vlgmr.msra.gmra.mrb[0].mxu0 %vm317_vm0, %v1885_v15  ;;  %1305 = vmatmul.mubr.msk.f32.vlgmr.msra.gmra.mrb[0].mxu1 %vm317_vm0, %v1885_v15 }
  0x51   : > { %436 = vmatprep.mubr.f32.mxu0 %v1754_v0  ;;  %597 = vmatprep.mubr.f32.mxu1 %v1754_v0 }
  0x52   : > { %1471 = vmatpush3.bf16.msra.mxu0 %v1468_v12  ;;  %1498 = vmatpush3.bf16.msra.mxu1 %v1468_v12 }
  0x53   : > { %1473 = vmatprep.subr.bf16.mxu0 %v1472_v16  ;;  %1493 = vmatprep.subr.bf16.mxu1 %v1472_v16 }
  0x54   : > { %1290 = vmatmul.mubr.msk.f32.gmra.mrb[2].mxu0 %vm317_vm0, %v1893_v19  ;;  %1306 = vmatmul.mubr.msk.f32.gmra.mrb[2].mxu1 %vm317_vm0, %v1893_v19 }
  0x55   : > { %442 = vmatprep.mubr.f32.mxu0 %v1754_v0  ;;  %603 = vmatprep.mubr.f32.mxu1 %v1754_v0 }
  0x56   : > { %1475 = vmatpush3.bf16.msra.mxu0 %v1472_v16  ;;  %1499 = vmatpush3.bf16.msra.mxu1 %v1472_v16 }
  0x57   : > { %1477 = vmatprep.subr.bf16.mxu0 %v1476_v20  ;;  %1494 = vmatprep.subr.bf16.mxu1 %v1476_v20 }
  0x58   : > { %1291 = vmatmul.mubr.msk.f32.gmra.mrb[4].mxu0 %vm317_vm0, %v1902_v23  ;;  %1307 = vmatmul.mubr.msk.f32.gmra.mrb[4].mxu1 %vm317_vm0, %v1902_v23 }
  0x59   : > { %448 = vmatprep.mubr.f32.mxu0 %v1754_v0  ;;  %609 = vmatprep.mubr.f32.mxu1 %v1754_v0 }
  0x5a   : > { %1479 = vmatpush3.bf16.msra.mxu0 %v1476_v20  ;;  %1500 = vmatpush3.bf16.msra.mxu1 %v1476_v20 }
  0x5b   : > { %1481 = vmatprep.subr.bf16.mxu0 %v1480_v24  ;;  %1495 = vmatprep.subr.bf16.mxu1 %v1480_v24 }
  0x5c   : > { %1292 = vmatmul.mubr.msk.f32.gmra.mrb[6].mxu0 %vm317_vm0, %v1911_v27  ;;  %1308 = vmatmul.mubr.msk.f32.gmra.mrb[6].mxu1 %vm317_vm0, %v1911_v27 }
  0x5d   : > { %454 = vmatprep.mubr.f32.mxu0 %v1754_v0  ;;  %615 = vmatprep.mubr.f32.mxu1 %v1754_v0 }
  0x5e   : > { %1483 = vmatpush3.bf16.msra.mxu0 %v1480_v24  ;;  %1501 = vmatpush3.bf16.msra.mxu1 %v1480_v24 }
  0x5f   : > { %1485 = vmatprep.subr.bf16.mxu0 %v1484_v28  ;;  %1496 = vmatprep.subr.bf16.mxu1 %v1484_v28 }
  0x60   : > { %1293 = vmatmul.mubr.msk.f32.gmra.mrb[8].mxu0 %vm317_vm0, %v1920_v31  ;;  %1309 = vmatmul.mubr.msk.f32.gmra.mrb[8].mxu1 %vm317_vm0, %v1920_v31 }
  0x61   : > { %460 = vmatprep.mubr.f32.mxu0 %v1754_v0  ;;  %621 = vmatprep.mubr.f32.mxu1 %v1754_v0 }
  0x62   : > { %1487 = vmatpush3.bf16.msra.mxu0 %v1484_v28  ;;  %1502 = vmatpush3.bf16.msra.mxu1 %v1484_v28 }
  0x63   : > { %1489 = vmatprep.subr.bf16.mxu0 %v1488_v32  ;;  %1497 = vmatprep.subr.bf16.mxu1 %v1488_v32 }
  0x64   : > { %1294 = vmatmul.mubr.msk.f32.gmra.mrb[10].mxu0 %vm317_vm0, %v1929_v33  ;;  %1310 = vmatmul.mubr.msk.f32.gmra.mrb[10].mxu1 %vm317_vm0, %v1929_v33 }
  0x65   : > { %466 = vmatprep.mubr.f32.mxu0 %v1754_v0  ;;  %627 = vmatprep.mubr.f32.mxu1 %v1754_v0 }
  0x66   : > { %1491 = vmatpush3.bf16.msra.mxu0 %v1488_v32  ;;  %1503 = vmatpush3.bf16.msra.mxu1 %v1488_v32 }
  0x68   : > { %1295 = vmatmul.mubr.msk.f32.gmra.mrb[12].mxu0 %vm317_vm0, %v220_v34  ;;  %1311 = vmatmul.mubr.msk.f32.gmra.mrb[12].mxu1 %vm317_vm0, %v220_v34 }
  0x69   : > { %472 = vmatprep.mubr.f32.mxu0 %v1754_v0  ;;  %633 = vmatprep.mubr.f32.mxu1 %v1754_v0 }
  0x6c   : > { %1296 = vmatmul.mubr.msk.f32.gmra.mrb[14].mxu0 %vm317_vm0, %v221_v35  ;;  %1312 = vmatmul.mubr.msk.f32.gmra.mrb[14].mxu1 %vm317_vm0, %v221_v35 }
  0x6d   : > { %478 = vmatprep.mubr.f32.mxu0 %v1754_v0  ;;  %639 = vmatprep.mubr.f32.mxu1 %v1754_v0 }
  0x70   : > { %1297 = vmatmul.mubr.msk.f32.gmra.mrb[16].mxu0 %vm317_vm0, %v222_v36  ;;  %1313 = vmatmul.mubr.msk.f32.gmra.mrb[16].mxu1 %vm317_vm0, %v222_v36 }
  0x71   : > { %484 = vmatprep.mubr.f32.mxu0 %v1754_v0  ;;  %645 = vmatprep.mubr.f32.mxu1 %v1754_v0 }
  0x74   : > { %1298 = vmatmul.mubr.msk.f32.gmra.mrb[18].mxu0 %vm317_vm0, %v223_v37  ;;  %1314 = vmatmul.mubr.msk.f32.gmra.mrb[18].mxu1 %vm317_vm0, %v223_v37 }
  0x75   : > { %490 = vmatprep.mubr.f32.mxu0 %v1754_v0  ;;  %651 = vmatprep.mubr.f32.mxu1 %v1754_v0 }
  0x78   : > { %1299 = vmatmul.mubr.msk.f32.gmra.mrb[20].mxu0 %vm317_vm0, %v224_v38  ;;  %1315 = vmatmul.mubr.msk.f32.gmra.mrb[20].mxu1 %vm317_vm0, %v224_v38 }
  0x79   : > { %496 = vmatprep.mubr.f32.mxu0 %v1754_v0  ;;  %657 = vmatprep.mubr.f32.mxu1 %v1754_v0 }
  0x7c   : > { %1300 = vmatmul.mubr.msk.f32.gmra.mrb[22].mxu0 %vm317_vm0, %v225_v39  ;;  %1316 = vmatmul.mubr.msk.f32.gmra.mrb[22].mxu1 %vm317_vm0, %v225_v39 }
  0x7d   : > { %502 = vmatprep.mubr.f32.mxu0 %v1754_v0  ;;  %663 = vmatprep.mubr.f32.mxu1 %v1754_v0 }
  0x80   : > { %1301 = vmatmul.mubr.msk.f32.gmra.mrb[24].mxu0 %vm317_vm0, %v226_v40  ;;  %1317 = vmatmul.mubr.msk.f32.gmra.mrb[24].mxu1 %vm317_vm0, %v226_v40 }
  0x81   : > { %508 = vmatprep.mubr.f32.mxu0 %v1754_v0  ;;  %669 = vmatprep.mubr.f32.mxu1 %v1754_v0 }
  0x84   : > { %1302 = vmatmul.mubr.msk.f32.gmra.mrb[26].mxu0 %vm317_vm0, %v227_v41  ;;  %1318 = vmatmul.mubr.msk.f32.gmra.mrb[26].mxu1 %vm317_vm0, %v227_v41 }
  0x85   : > { %514 = vmatprep.mubr.f32.mxu0 %v1754_v0  ;;  %675 = vmatprep.mubr.f32.mxu1 %v1754_v0 }
  0x88   : > { %1303 = vmatmul.mubr.msk.f32.gmra.mrb[28].mxu0 %vm317_vm0, %v228_v42  ;;  %1319 = vmatmul.mubr.msk.f32.gmra.mrb[28].mxu1 %vm317_vm0, %v228_v42 }
  0x89   : > { %520 = vmatprep.mubr.f32.mxu0 %v1754_v0  ;;  %681 = vmatprep.mubr.f32.mxu1 %v1754_v0  ;;  %v292_v0 = vlaneseq }
  0x8b   : > { %v2008_v44 = vshrl.u32 %v292_v0, 7 }
  0x8c   : > { %1304 = vmatmul.mubr.msk.f32.gmra.mrb[30].mxu0 %vm317_vm0, %v229_v43  ;;  %1320 = vmatmul.mubr.msk.f32.gmra.mrb[30].mxu1 %vm317_vm0, %v229_v43 }
  0x8d   : > { %1396 = vmatprep.mubr.msk.f32.mxu0 %vm317_vm0, %v1885_v15  ;;  %1408 = vmatprep.mubr.msk.f32.mxu1 %vm317_vm0, %v222_v36  ;;  %v294_v45 = vsub.s32 0, %v2008_v44  ;;  %v302_v47 = vsub.s32 2, %v2008_v44  ;;  %v298_v48 = vsub.s32 1, %v2008_v44 }
  0x8f   : > { %v2019_v49 = vrot.slane %v2014_v46, %v294_v45  ;;  %v2022_v50 = vrot.slane %v2014_v46, %v302_v47  ;;  %v2025_v51 = vrot.slane %v2014_v46, %v298_v48 }
  0x90   : > { %1397 = vmatmul.mubr.msk.f32.vlgmr.msra.gmra.mrb[32].mxu0 %vm317_vm0, %v1893_v19  ;;  %1409 = vmatmul.mubr.msk.f32.vlgmr.msra.gmra.mrb[32].mxu1 %vm317_vm0, %v223_v37 }
  0x91   : > { %1399 = vmatprep.mubr.msk.f32.mxu0 %vm317_vm0, %v1902_v23  ;;  %1411 = vmatprep.mubr.msk.f32.mxu1 %vm317_vm0, %v224_v38 }
  0x94   : > { %1400 = vmatmul.mubr.msk.f32.gmra.mrb[34].mxu0 %vm317_vm0, %v1911_v27  ;;  %1412 = vmatmul.mubr.msk.f32.gmra.mrb[34].mxu1 %vm317_vm0, %v225_v39 }
  0x95   : > { %1402 = vmatprep.mubr.msk.f32.mxu0 %vm317_vm0, %v1920_v31  ;;  %1414 = vmatprep.mubr.msk.f32.mxu1 %vm317_vm0, %v226_v40 }
  0x98   : > { %1403 = vmatmul.mubr.msk.f32.gmra.mrb[36].mxu0 %vm317_vm0, %v1929_v33  ;;  %1415 = vmatmul.mubr.msk.f32.gmra.mrb[36].mxu1 %vm317_vm0, %v227_v41 }
  0x99   : > { %1405 = vmatprep.mubr.msk.f32.mxu0 %vm317_vm0, %v220_v34  ;;  %1417 = vmatprep.mubr.msk.f32.mxu1 %vm317_vm0, %v228_v42 }
  0x9c   : > { %1406 = vmatmul.mubr.msk.f32.gmra.mrb[38].mxu0 %vm317_vm0, %v221_v35  ;;  %1418 = vmatmul.mubr.msk.f32.gmra.mrb[38].mxu1 %vm317_vm0, %v229_v43 }
 0x123   : > { %v432_v52 = vpop.f32.mrb[0].mxu0  ;;  %v593_v54 = vpop.f32.mrb[0].mxu1 }
 0x124   : > { %v433_v53 = vadd.f32 %v432_v52, %v2019_v49  ;;  %v434_v55 = vpop.f32.mrb[1].mxu0  ;;  %v594_v56 = vadd.f32 %v593_v54, %v2022_v50  ;;  %v2030_v58 = vpop.f32.mrb[1].mxu1 }
 0x125   : > { %v435_v57 = vadd.f32 %v434_v55, %v2025_v51 }
 0x126   : > { %v881_v60 = vmul.f32 %v594_v56, %v433_v53 }
 0x127   : > { %v438_v59 = vpop.f32.mrb[2].mxu0  ;;  %v833_v61 = vmul.f32 %v435_v57, %v433_v53  ;;  %v599_v63 = vpop.f32.mrb[2].mxu1 }
 0x128   : > { %v439_v62 = vadd.f32 %v438_v59, %v2019_v49  ;;  %v440_v1 = vpop.f32.mrb[3].mxu0  ;;  %v600_v2 = vadd.f32 %v599_v63, %v2022_v50  ;;  %v2035_v4 = vpop.f32.mrb[3].mxu1  ;;  %897 = vadd.xlane.f32.xlu0 %v881_v60 }
 0x129   : > { %v441_v3 = vadd.f32 %v440_v1, %v2025_v51 }
 0x12a   : > { %v882_v6 = vmul.f32 %v600_v2, %v439_v62 }
 0x12b   : > { %v444_v5 = vpop.f32.mrb[4].mxu0  ;;  %v834_v7 = vmul.f32 %v441_v3, %v439_v62  ;;  %v605_v9 = vpop.f32.mrb[4].mxu1 }
 0x12c   : > { %v445_v8 = vadd.f32 %v444_v5, %v2019_v49  ;;  %v446_v10 = vpop.f32.mrb[5].mxu0  ;;  %v606_v11 = vadd.f32 %v605_v9, %v2022_v50  ;;  %v2040_v13 = vpop.f32.mrb[5].mxu1  ;;  %899 = vadd.xlane.f32.xlu1 %v882_v6  ;;  %849 = vadd.xlane.f32.xlu0 %v833_v61 }
 0x12d   : > { %v447_v12 = vadd.f32 %v446_v10, %v2025_v51 }
 0x12e   : > { %v883_v16 = vmul.f32 %v606_v11, %v445_v8 }
 0x12f   : > { %v450_v14 = vpop.f32.mrb[6].mxu0  ;;  %v835_v15 = vmul.f32 %v447_v12, %v445_v8  ;;  %v611_v18 = vpop.f32.mrb[6].mxu1 }
 0x130   : > { %v451_v17 = vadd.f32 %v450_v14, %v2019_v49  ;;  %v452_v19 = vpop.f32.mrb[7].mxu0  ;;  %v612_v20 = vadd.f32 %v611_v18, %v2022_v50  ;;  %v2045_v22 = vpop.f32.mrb[7].mxu1  ;;  %851 = vadd.xlane.f32.xlu0 %v834_v7 }
 0x131   : > { %v453_v21 = vadd.f32 %v452_v19, %v2025_v51  ;;  %853 = vadd.xlane.f32.xlu1 %v835_v15 }
 0x132   : > { %v884_v24 = vmul.f32 %v612_v20, %v451_v17 }
 0x133   : > { %v456_v23 = vpop.f32.mrb[8].mxu0  ;;  %v836_v25 = vmul.f32 %v453_v21, %v451_v17  ;;  %v617_v27 = vpop.f32.mrb[8].mxu1 }
 0x134   : > { %v457_v26 = vadd.f32 %v456_v23, %v2019_v49  ;;  %v458_v28 = vpop.f32.mrb[9].mxu0  ;;  %v618_v29 = vadd.f32 %v617_v27, %v2022_v50  ;;  %v2050_v31 = vpop.f32.mrb[9].mxu1  ;;  %901 = vadd.xlane.f32.xlu0 %v883_v16 }
 0x135   : > { %v459_v30 = vadd.f32 %v458_v28, %v2025_v51  ;;  %903 = vadd.xlane.f32.xlu1 %v884_v24 }
 0x136   : > { %v885_v33 = vmul.f32 %v618_v29, %v457_v26 }
 0x137   : > { %v462_v32 = vpop.f32.mrb[10].mxu0  ;;  %v837_v34 = vmul.f32 %v459_v30, %v457_v26  ;;  %v623_v36 = vpop.f32.mrb[10].mxu1 }
 0x138   : > { %v463_v35 = vadd.f32 %v462_v32, %v2019_v49  ;;  %v464_v37 = vpop.f32.mrb[11].mxu0  ;;  %v624_v38 = vadd.f32 %v623_v36, %v2022_v50  ;;  %v2055_v40 = vpop.f32.mrb[11].mxu1  ;;  %905 = vadd.xlane.f32.xlu0 %v885_v33 }
 0x139   : > { %v465_v39 = vadd.f32 %v464_v37, %v2025_v51  ;;  %855 = vadd.xlane.f32.xlu1 %v836_v25 }
 0x13a   : > { %v886_v42 = vmul.f32 %v624_v38, %v463_v35 }
 0x13b   : > { %v468_v41 = vpop.f32.mrb[12].mxu0  ;;  %v838_v43 = vmul.f32 %v465_v39, %v463_v35  ;;  %v629_v45 = vpop.f32.mrb[12].mxu1 }
 0x13c   : > { %v469_v0 = vadd.f32 %v468_v41, %v2019_v49  ;;  %v470_v47 = vpop.f32.mrb[13].mxu0  ;;  %v630_v48 = vadd.f32 %v629_v45, %v2022_v50  ;;  %v2060_v53 = vpop.f32.mrb[13].mxu1  ;;  %857 = vadd.xlane.f32.xlu0 %v837_v34 }
 0x13d   : > { %v471_v52 = vadd.f32 %v470_v47, %v2025_v51  ;;  %907 = vadd.xlane.f32.xlu1 %v886_v42 }
 0x13e   : > { %v887_v55 = vmul.f32 %v630_v48, %v469_v0 }
 0x13f   : > { %v474_v54 = vpop.f32.mrb[14].mxu0  ;;  %v839_v56 = vmul.f32 %v471_v52, %v469_v0  ;;  %v635_v59 = vpop.f32.mrb[14].mxu1 }
 0x140   : > { %v475_v57 = vadd.f32 %v474_v54, %v2019_v49  ;;  %v476_v60 = vpop.f32.mrb[15].mxu0  ;;  %v636_v61 = vadd.f32 %v635_v59, %v2022_v50  ;;  %v2065_v63 = vpop.f32.mrb[15].mxu1  ;;  %909 = vadd.xlane.f32.xlu0 %v887_v55 }
 0x141   : > { %v477_v62 = vadd.f32 %v476_v60, %v2025_v51  ;;  %859 = vadd.xlane.f32.xlu1 %v838_v43 }
 0x142   : > { %v888_v2 = vmul.f32 %v636_v61, %v475_v57 }
 0x143   : > { %v480_v1 = vpop.f32.mrb[16].mxu0  ;;  %v840_v3 = vmul.f32 %v477_v62, %v475_v57  ;;  %v641_v6 = vpop.f32.mrb[16].mxu1 }
 0x144   : > { %v481_v5 = vadd.f32 %v480_v1, %v2019_v49  ;;  %v482_v7 = vpop.f32.mrb[17].mxu0  ;;  %v642_v8 = vadd.f32 %v641_v6, %v2022_v50  ;;  %v2070_v10 = vpop.f32.mrb[17].mxu1  ;;  %861 = vadd.xlane.f32.xlu0 %v839_v56 }
 0x145   : > { %v483_v9 = vadd.f32 %v482_v7, %v2025_v51  ;;  %911 = vadd.xlane.f32.xlu1 %v888_v2 }
 0x146   : > { %v889_v12 = vmul.f32 %v642_v8, %v481_v5 }
 0x147   : > { %v486_v11 = vpop.f32.mrb[18].mxu0  ;;  %v841_v14 = vmul.f32 %v483_v9, %v481_v5  ;;  %v647_v16 = vpop.f32.mrb[18].mxu1 }
 0x148   : > { %v487_v15 = vadd.f32 %v486_v11, %v2019_v49  ;;  %v488_v17 = vpop.f32.mrb[19].mxu0  ;;  %v648_v18 = vadd.f32 %v647_v16, %v2022_v50  ;;  %v2075_v20 = vpop.f32.mrb[19].mxu1  ;;  %913 = vadd.xlane.f32.xlu0 %v889_v12 }
 0x149   : > { %v489_v19 = vadd.f32 %v488_v17, %v2025_v51  ;;  %863 = vadd.xlane.f32.xlu1 %v840_v3 }
 0x14a   : > { %v890_v23 = vmul.f32 %v648_v18, %v487_v15 }
 0x14b   : > { %v492_v21 = vpop.f32.mrb[20].mxu0  ;;  %v842_v24 = vmul.f32 %v489_v19, %v487_v15  ;;  %v653_v26 = vpop.f32.mrb[20].mxu1 }
 0x14c   : > { %v493_v25 = vadd.f32 %v492_v21, %v2019_v49  ;;  %v494_v27 = vpop.f32.mrb[21].mxu0  ;;  %v654_v28 = vadd.f32 %v653_v26, %v2022_v50  ;;  %v2080_v30 = vpop.f32.mrb[21].mxu1  ;;  %865 = vadd.xlane.f32.xlu0 %v841_v14 }
 0x14d   : > { %v495_v29 = vadd.f32 %v494_v27, %v2025_v51  ;;  %915 = vadd.xlane.f32.xlu1 %v890_v23 }
 0x14e   : > { %v891_v33 = vmul.f32 %v654_v28, %v493_v25 }
 0x14f   : > { %v498_v32 = vpop.f32.mrb[22].mxu0  ;;  %v843_v34 = vmul.f32 %v495_v29, %v493_v25  ;;  %v659_v36 = vpop.f32.mrb[22].mxu1 }
 0x150   : > { %v499_v35 = vadd.f32 %v498_v32, %v2019_v49  ;;  %v500_v37 = vpop.f32.mrb[23].mxu0  ;;  %v660_v38 = vadd.f32 %v659_v36, %v2022_v50  ;;  %v2085_v41 = vpop.f32.mrb[23].mxu1  ;;  %917 = vadd.xlane.f32.xlu0 %v891_v33 }
 0x151   : > { %v501_v39 = vadd.f32 %v500_v37, %v2025_v51  ;;  %867 = vadd.xlane.f32.xlu1 %v842_v24 }
 0x152   : > { %v892_v43 = vmul.f32 %v660_v38, %v499_v35 }
 0x153   : > { %v504_v42 = vpop.f32.mrb[24].mxu0  ;;  %v844_v0 = vmul.f32 %v501_v39, %v499_v35  ;;  %v665_v47 = vpop.f32.mrb[24].mxu1 }
 0x154   : > { %v505_v45 = vadd.f32 %v504_v42, %v2019_v49  ;;  %v506_v48 = vpop.f32.mrb[25].mxu0  ;;  %v666_v52 = vadd.f32 %v665_v47, %v2022_v50  ;;  %v2090_v55 = vpop.f32.mrb[25].mxu1  ;;  %869 = vadd.xlane.f32.xlu0 %v843_v34 }
 0x155   : > { %v507_v54 = vadd.f32 %v506_v48, %v2025_v51  ;;  %919 = vadd.xlane.f32.xlu1 %v892_v43 }
 0x156   : > { %v893_v57 = vmul.f32 %v666_v52, %v505_v45 }
 0x157   : > { %v510_v56 = vpop.f32.mrb[26].mxu0  ;;  %v845_v59 = vmul.f32 %v507_v54, %v505_v45  ;;  %v671_v61 = vpop.f32.mrb[26].mxu1 }
 0x158   : > { %v511_v60 = vadd.f32 %v510_v56, %v2019_v49  ;;  %v512_v62 = vpop.f32.mrb[27].mxu0  ;;  %v672_v1 = vadd.f32 %v671_v61, %v2022_v50  ;;  %v2095_v3 = vpop.f32.mrb[27].mxu1  ;;  %921 = vadd.xlane.f32.xlu0 %v893_v57 }
 0x159   : > { %v513_v2 = vadd.f32 %v512_v62, %v2025_v51  ;;  %871 = vadd.xlane.f32.xlu1 %v844_v0 }
 0x15a   : > { %v894_v6 = vmul.f32 %v672_v1, %v511_v60 }
 0x15b   : > { %v516_v5 = vpop.f32.mrb[28].mxu0  ;;  %v846_v7 = vmul.f32 %v513_v2, %v511_v60  ;;  %v677_v9 = vpop.f32.mrb[28].mxu1 }
 0x15c   : > { %v517_v8 = vadd.f32 %v516_v5, %v2019_v49  ;;  %v518_v11 = vpop.f32.mrb[29].mxu0  ;;  %v678_v12 = vadd.f32 %v677_v9, %v2022_v50  ;;  %873 = vadd.xlane.f32.xlu0 %v845_v59  ;;  %v2100_v15 = vpop.f32.mrb[29].mxu1 }
 0x15d   : > { %v519_v14 = vadd.f32 %v518_v11, %v2025_v51  ;;  %923 = vadd.xlane.f32.xlu1 %v894_v6 }
 0x15e   : > { %v895_v18 = vmul.f32 %v678_v12, %v517_v8 }
 0x15f   : > { %v522_v16 = vpop.f32.mrb[30].mxu0  ;;  %v847_v17 = vmul.f32 %v519_v14, %v517_v8  ;;  %v683_v21 = vpop.f32.mrb[30].mxu1 }
 0x160   : > { %v523_v19 = vadd.f32 %v522_v16, %v2019_v49  ;;  %v524_v23 = vpop.f32.mrb[31].mxu0  ;;  %v684_v24 = vadd.f32 %v683_v21, %v2022_v50  ;;  %v2105_v26 = vpop.f32.mrb[31].mxu1 }
 0x161   : > { %v525_v25 = vadd.f32 %v524_v23, %v2025_v51  ;;  %875 = vadd.xlane.f32.xlu1 %v846_v7  ;;  %877 = vadd.xlane.f32.xlu0 %v847_v17 }
 0x162   : > { %v896_v28 = vmul.f32 %v684_v24, %v523_v19 }
 0x163   : > { %v848_v27 = vmul.f32 %v525_v25, %v523_v19  ;;  %v2107_v29 = vpop.f32.mrb[32].mxu0  ;;  %v2123_v36 = vpop.f32.mrb[32].mxu1 }
 0x164   : > { %v2109_v32 = vpop.f32.mrb[33].mxu0  ;;  %v2125_v37 = vpop.f32.mrb[33].mxu1 }
 0x165   : > { %879 = vadd.xlane.f32.xlu1 %v848_v27  ;;  %925 = vadd.xlane.f32.xlu0 %v895_v18 }
 0x167   : > { %v2111_v33 = vpop.f32.mrb[34].mxu0  ;;  %v2127_v38 = vpop.f32.mrb[34].mxu1 }
 0x168   : > { %v2113_v49 = vpop.f32.mrb[35].mxu0  ;;  %v2129_v39 = vpop.f32.mrb[35].mxu1 }
 0x169   : > { %927 = vadd.xlane.f32.xlu1 %v896_v28 }
 0x16b   : > { %v2115_v50 = vpop.f32.mrb[36].mxu0  ;;  %v2131_v42 = vpop.f32.mrb[36].mxu1 }
 0x16c   : > { %v2117_v51 = vpop.f32.mrb[37].mxu0  ;;  %v2133_v43 = vpop.f32.mrb[37].mxu1 }
 0x16f   : > { %v2119_v34 = vpop.f32.mrb[38].mxu0  ;;  %v2135_v0 = vpop.f32.mrb[38].mxu1 }
 0x170   : > { %v2121_v35 = vpop.f32.mrb[39].mxu0  ;;  %v2137_v45 = vpop.f32.mrb[39].mxu1 }
 0x1b5   : > { %v898_v47 = vpop.xlane.xlu0 %897 }
 0x1b9   : > { %v900_v48 = vpop.xlane.xlu1 %899  ;;  %v850_v52 = vpop.xlane.xlu0 %849 }
 0x1ba   : > { %v929_v54 = vmax.f32 %v850_v52, %v898_v47 }
 0x1bc   : > { %v945_v56 = vsub.f32 %v850_v52, %v929_v54  ;;  %v993_v57 = vsub.f32 %v898_v47, %v929_v54 }
 0x1bd   : > { %v852_v59 = vpop.xlane.xlu0 %851 }
 0x1be   : > { %v854_v60 = vpop.xlane.xlu1 %853  ;;  %v961_v61 = vmul.f32 1.442695, %v945_v56  ;;  %v1009_v62 = vmul.f32 1.442695, %v993_v57  ;;  %v930_v1 = vmax.f32 %v852_v59, %v900_v48  ;;  %v306_v56 = vsub.s32 3, %v2008_v44 }
 0x1c0   : > { %1559 = vpow2.f32 %v961_v61  ;;  %v946_v2 = vsub.f32 %v852_v59, %v930_v1  ;;  %v994_v5 = vsub.f32 %v900_v48, %v930_v1 }
 0x1c1   : > { %1561 = vpow2.f32 %v1009_v62  ;;  %v902_v6 = vpop.xlane.xlu0 %901 }
 0x1c2   : > { %v904_v7 = vpop.xlane.xlu1 %903  ;;  %v963_v8 = vmul.f32 1.442695, %v946_v2  ;;  %v1011_v9 = vmul.f32 1.442695, %v994_v5  ;;  %v931_v11 = vmax.f32 %v854_v60, %v902_v6 }
 0x1c4   : > { %1563 = vpow2.f32 %v963_v8  ;;  %v947_v12 = vsub.f32 %v854_v60, %v931_v11  ;;  %v995_v14 = vsub.f32 %v902_v6, %v931_v11  ;;  %v2148_v8 = vrot.slane %v2014_v46, %v306_v56 }
 0x1c5   : > { %1565 = vpow2.f32 %v1011_v9  ;;  %v906_v16 = vpop.xlane.xlu0 %905  ;;  %v310_v9 = vsub.s32 4, %v2008_v44 }
 0x1c6   : > { %v856_v17 = vpop.xlane.xlu1 %855  ;;  %v965_v18 = vmul.f32 1.442695, %v947_v12  ;;  %v1013_v19 = vmul.f32 1.442695, %v995_v14  ;;  %v596_v44 = vadd.f32 %v2030_v58, %v2148_v8  ;;  %v2168_v56 = vadd.f32 %v2040_v13, %v2148_v8 }
 0x1c7   : > { %v932_v21 = vmax.f32 %v856_v17, %v904_v7  ;;  %v2184_v13 = vadd.f32 %v2055_v40, %v2148_v8  ;;  %v2197_v40 = vadd.f32 %v2065_v63, %v2148_v8 }
 0x1c8   : > { %1567 = vpow2.f32 %v965_v18 }
 0x1c9   : > { %v948_v23 = vsub.f32 %v856_v17, %v932_v21  ;;  %v996_v24 = vsub.f32 %v904_v7, %v932_v21  ;;  %1569 = vpow2.f32 %v1013_v19  ;;  %v858_v25 = vpop.xlane.xlu0 %857 }
 0x1ca   : > { %v908_v27 = vpop.xlane.xlu1 %907  ;;  %v2139_v28 = vpop.eup %1559  ;;  %v933_v52 = vmax.f32 %v858_v25, %v906_v16 }
 0x1cb   : > { %v967_v47 = vmul.f32 1.442695, %v948_v23  ;;  %v1015_v48 = vmul.f32 1.442695, %v996_v24  ;;  %v1562_v54 = vpop.eup %1561 }
 0x1cc   : > { %v1041_v57 = vadd.f32 %v1562_v54, %v2139_v28  ;;  %v949_v59 = vsub.f32 %v858_v25, %v933_v52  ;;  %v997_v60 = vsub.f32 %v906_v16, %v933_v52  ;;  %v2160_v25 = vrot.slane %v2014_v46, %v310_v9 }
 0x1cd   : > { %1571 = vpow2.f32 %v967_v47  ;;  %v910_v61 = vpop.xlane.xlu0 %909  ;;  %v602_v52 = vadd.f32 %v2035_v4, %v2148_v8  ;;  %v2180_v4 = vadd.f32 %v2050_v31, %v2148_v8 }
 0x1ce   : > { %1573 = vpow2.f32 %v1015_v48  ;;  %v860_v62 = vpop.xlane.xlu1 %859  ;;  %v2143_v1 = vpop.eup %1563  ;;  %v969_v2 = vmul.f32 1.442695, %v949_v59  ;;  %v1017_v5 = vmul.f32 1.442695, %v997_v60  ;;  %v760_v63 = vadd.f32 %v2107_v29, %v2160_v25 }
 0x1cf   : > { %1575 = vrcp.f32 %v1041_v57  ;;  %v934_v6 = vmax.f32 %v860_v62, %v908_v27  ;;  %v2145_v7 = vpop.eup %1565  ;;  %v2172_v57 = vadd.f32 %v2045_v22, %v2148_v8  ;;  %v2188_v22 = vadd.f32 %v2060_v53, %v2148_v8 }
 0x1d0   : > { %v1042_v11 = vadd.f32 %v2145_v7, %v2143_v1  ;;  %1577 = vpow2.f32 %v969_v2 }
 0x1d1   : > { %v950_v12 = vsub.f32 %v860_v62, %v934_v6  ;;  %v998_v14 = vsub.f32 %v908_v27, %v934_v6  ;;  %1579 = vpow2.f32 %v1017_v5  ;;  %v862_v16 = vpop.xlane.xlu0 %861  ;;  %v755_v5 = vadd.f32 %v2109_v32, %v2160_v25 }
 0x1d2   : > { %v912_v17 = vpop.xlane.xlu1 %911  ;;  %v2153_v18 = vpop.eup %1567  ;;  %1581 = vrcp.f32 %v1042_v11  ;;  %v935_v23 = vmax.f32 %v862_v16, %v910_v61 }
 0x1d3   : > { %v971_v19 = vmul.f32 1.442695, %v950_v12  ;;  %v1019_v21 = vmul.f32 1.442695, %v998_v14  ;;  %v2155_v24 = vpop.eup %1569 }
 0x1d4   : > { %v1043_v27 = vadd.f32 %v2155_v24, %v2153_v18  ;;  %v951_v47 = vsub.f32 %v862_v16, %v935_v23  ;;  %v999_v48 = vsub.f32 %v910_v61, %v935_v23 }
 0x1d5   : > { %1583 = vpow2.f32 %v971_v19  ;;  %v914_v46 = vpop.xlane.xlu0 %913 }
 0x1d6   : > { %1585 = vpow2.f32 %v1019_v21  ;;  %v864_v58 = vpop.xlane.xlu1 %863  ;;  %v973_v60 = vmul.f32 1.442695, %v951_v47  ;;  %v1021_v61 = vmul.f32 1.442695, %v999_v48 }
 0x1d7   : > { %v2174_v59 = vpop.eup %1571  ;;  %1587 = vrcp.f32 %v1043_v27  ;;  %v936_v62 = vmax.f32 %v864_v58, %v912_v17 }
 0x1d8   : > { %v2176_v2 = vpop.eup %1573  ;;  %1589 = vpow2.f32 %v973_v60 }
 0x1d9   : > { %v1576_v6 = vpop.eup %1575  ;;  %v1044_v9 = vadd.f32 %v2176_v2, %v2174_v59  ;;  %v952_v31 = vsub.f32 %v864_v58, %v936_v62  ;;  %v1000_v11 = vsub.f32 %v912_v17, %v936_v62  ;;  %1591 = vpow2.f32 %v1021_v61  ;;  %v866_v14 = vpop.xlane.xlu0 %865  ;;  %v2219_v58 = vld [vmem:[%s2420_s3] ss:$0 sm:$0xff] }
 0x1da   : > { %v1073_v53 = vmul.f32 %v1576_v6, %v2139_v28  ;;  %v1105_v12 = vmul.f32 %v1576_v6, %v1562_v54  ;;  %v916_v16 = vpop.xlane.xlu1 %915  ;;  %v2200_v32 = vpop.eup %1577  ;;  %v937_v23 = vmax.f32 %v866_v14, %v914_v46  ;;  %v2206_v17 = vadd.f32 %v2070_v10, %v2148_v8 }
 0x1db   : > { %1593 = vrcp.f32 %v1044_v9  ;;  %v975_v19 = vmul.f32 1.442695, %v952_v31  ;;  %v1023_v21 = vmul.f32 1.442695, %v1000_v11  ;;  %v2202_v27 = vpop.eup %1579 }
 0x1dc   : > { %v1089_v28 = vmul.f32 %v1073_v53, %v596_v44  ;;  %v1121_v54 = vmul.f32 %v1105_v12, %v755_v5  ;;  %v1582_v47 = vpop.eup %1581  ;;  %v1045_v48 = vadd.f32 %v2202_v27, %v2200_v32  ;;  %v953_v10 = vsub.f32 %v866_v14, %v937_v23 }
 0x1dd   : > { %1595 = vpow2.f32 %v975_v19  ;;  %v1001_v60 = vsub.f32 %v914_v46, %v937_v23  ;;  %v1074_v61 = vmul.f32 %v1582_v47, %v2143_v1  ;;  %v1106_v62 = vmul.f32 %v1582_v47, %v2145_v7  ;;  %v918_v44 = vpop.xlane.xlu0 %917 }
 0x1de   : > { %1597 = vpow2.f32 %v1023_v21  ;;  %v1137_v29 = vadd.f32 %v1121_v54, %v1089_v28  ;;  %v868_v5 = vpop.xlane.xlu1 %867  ;;  %v977_v9 = vmul.f32 1.442695, %v953_v10  ;;  %v765_v1 = vadd.f32 %v2113_v49, %v2160_v25 }
 0x1df   : > { %v2223_v6 = vpop.eup %1583  ;;  %1599 = vrcp.f32 %v1045_v48  ;;  %v1025_v31 = vmul.f32 1.442695, %v1001_v60  ;;  %v938_v11 = vmax.f32 %v868_v5, %v916_v16  ;;  %v1090_v12 = vmul.f32 %v1074_v61, %v602_v52 }
 0x1e0   : > { %v2225_v53 = vpop.eup %1585  ;;  %v1122_v14 = vmul.f32 %v1106_v62, %v760_v63  ;;  %v1160_v46 = vadd.f32 %v2219_v58, %v1137_v29  ;;  %1601 = vpow2.f32 %v977_v9  ;;  %v770_v62 = vadd.f32 %v2111_v33, %v2160_v25 }
 0x1e1   : > { %v1588_v7 = vpop.eup %1587  ;;  %v1046_v19 = vadd.f32 %v2225_v53, %v2223_v6  ;;  %v954_v21 = vsub.f32 %v868_v5, %v938_v11  ;;  %v1002_v23 = vsub.f32 %v916_v16, %v938_v11  ;;  %1603 = vpow2.f32 %v1025_v31  ;;  %v870_v54 = vpop.xlane.xlu0 %869 }
 0x1e2   : > { %v1138_v28 = vadd.f32 %v1122_v14, %v1090_v12  ;;  %1176 = vst [vmem:[%s2233_s12] sm:$0xff] %v1160_v46  ;;  %v1075_v52 = vmul.f32 %v1588_v7, %v2153_v18  ;;  %v1107_v63 = vmul.f32 %v1588_v7, %v2155_v24  ;;  %v920_v47 = vpop.xlane.xlu1 %919  ;;  %v2238_v49 = vpop.eup %1589  ;;  %v939_v60 = vmax.f32 %v870_v54, %v918_v44 }
 0x1e3   : > { %1605 = vrcp.f32 %v1046_v19  ;;  %v979_v48 = vmul.f32 1.442695, %v954_v21  ;;  %v1027_v10 = vmul.f32 1.442695, %v1002_v23  ;;  %v2240_v16 = vpop.eup %1591 }
 0x1e4   : > { %v1161_v61 = vadd.f32 %v2219_v58, %v1138_v28  ;;  %v1091_v18 = vmul.f32 %v1075_v52, %v2168_v56  ;;  %v1123_v29 = vmul.f32 %v1107_v63, %v765_v1  ;;  %v1047_v5 = vadd.f32 %v2240_v16, %v2238_v49 }
 0x1e5   : > { %v1594_v24 = vpop.eup %1593  ;;  %1607 = vpow2.f32 %v979_v48  ;;  %v955_v9 = vsub.f32 %v870_v54, %v939_v60  ;;  %v1003_v31 = vsub.f32 %v918_v44, %v939_v60  ;;  %v922_v46 = vpop.xlane.xlu0 %921 }
 0x1e6   : > { %1177 = vst [vmem:[%s2233_s12 + $0x8] sm:$0xff] %v1161_v61  ;;  %v1076_v11 = vmul.f32 %v1594_v24, %v2174_v59  ;;  %v1108_v12 = vmul.f32 %v1594_v24, %v2176_v2  ;;  %1609 = vpow2.f32 %v1027_v10  ;;  %v1139_v14 = vadd.f32 %v1123_v29, %v1091_v18  ;;  %v872_v7 = vpop.xlane.xlu1 %871 }
 0x1e7   : > { %v2251_v33 = vpop.eup %1595  ;;  %1611 = vrcp.f32 %v1047_v5  ;;  %v981_v56 = vmul.f32 1.442695, %v955_v9  ;;  %v1029_v1 = vmul.f32 1.442695, %v1003_v31  ;;  %v940_v19 = vmax.f32 %v872_v7, %v920_v47 }
 0x1e8   : > { %v2253_v21 = vpop.eup %1597  ;;  %v1092_v44 = vmul.f32 %v1076_v11, %v2172_v57  ;;  %v1124_v23 = vmul.f32 %v1108_v12, %v770_v62  ;;  %v1162_v59 = vadd.f32 %v2219_v58, %v1139_v14  ;;  %v775_v2 = vadd.f32 %v2117_v51, %v2160_v25 }
 0x1e9   : > { %v1600_v28 = vpop.eup %1599  ;;  %v1048_v52 = vadd.f32 %v2253_v21, %v2251_v33  ;;  %1613 = vpow2.f32 %v981_v56  ;;  %v956_v63 = vsub.f32 %v872_v7, %v940_v19  ;;  %v1004_v54 = vsub.f32 %v920_v47, %v940_v19  ;;  %v874_v60 = vpop.xlane.xlu0 %873 }
 0x1ea   : > { %v1140_v48 = vadd.f32 %v1124_v23, %v1092_v44  ;;  %1178 = vst [vmem:[%s2233_s12 + $0x10] sm:$0xff] %v1162_v59  ;;  %1615 = vpow2.f32 %v1029_v1  ;;  %v1077_v10 = vmul.f32 %v1600_v28, %v2200_v32  ;;  %v1109_v57 = vmul.f32 %v1600_v28, %v2202_v27  ;;  %v924_v61 = vpop.xlane.xlu1 %923  ;;  %v2264_v62 = vpop.eup %1601 }
 0x1eb   : > { %1617 = vrcp.f32 %v1048_v52  ;;  %v983_v51 = vmul.f32 1.442695, %v956_v63  ;;  %v1031_v18 = vmul.f32 1.442695, %v1004_v54  ;;  %v941_v29 = vmax.f32 %v874_v60, %v922_v46  ;;  %v2266_v24 = vpop.eup %1603 }
 0x1ec   : > { %v1163_v47 = vadd.f32 %v2219_v58, %v1140_v48  ;;  %v780_v5 = vadd.f32 %v2115_v50, %v2160_v25  ;;  %v1093_v32 = vmul.f32 %v1077_v10, %v2180_v4  ;;  %v1125_v9 = vmul.f32 %v1109_v57, %v775_v2 }
 0x1ed   : > { %v1606_v27 = vpop.eup %1605  ;;  %v1049_v31 = vadd.f32 %v2266_v24, %v2264_v62  ;;  %1619 = vpow2.f32 %v983_v51  ;;  %v957_v11 = vsub.f32 %v874_v60, %v941_v29  ;;  %v1005_v12 = vsub.f32 %v922_v46, %v941_v29 }
 0x1ee   : > { %1179 = vst [vmem:[%s2233_s12 + $0x18] sm:$0xff] %v1163_v47  ;;  %v1078_v14 = vmul.f32 %v1606_v27, %v2223_v6  ;;  %v1110_v7 = vmul.f32 %v1606_v27, %v2225_v53  ;;  %1621 = vpow2.f32 %v1031_v18  ;;  %v1141_v56 = vadd.f32 %v1125_v9, %v1093_v32  ;;  %v876_v1 = vpop.xlane.xlu1 %875  ;;  %v878_v19 = vpop.xlane.xlu0 %877 }
 0x1ef   : > { %v2277_v50 = vpop.eup %1607  ;;  %1623 = vrcp.f32 %v1049_v31  ;;  %v985_v4 = vmul.f32 1.442695, %v957_v11  ;;  %v1033_v44 = vmul.f32 1.442695, %v1005_v12  ;;  %v942_v23 = vmax.f32 %v876_v1, %v924_v61 }
 0x1f0   : > { %v2279_v59 = vpop.eup %1609  ;;  %v1094_v46 = vmul.f32 %v1078_v14, %v2184_v13  ;;  %v1126_v2 = vmul.f32 %v1110_v7, %v780_v5  ;;  %v1164_v6 = vadd.f32 %v2219_v58, %v1141_v56  ;;  %v785_v53 = vadd.f32 %v2121_v35, %v2160_v25 }
 0x1f1   : > { %v1612_v28 = vpop.eup %1611  ;;  %v1050_v52 = vadd.f32 %v2279_v59, %v2277_v50  ;;  %1625 = vpow2.f32 %v985_v4  ;;  %v958_v63 = vsub.f32 %v876_v1, %v942_v23  ;;  %v1006_v54 = vsub.f32 %v924_v61, %v942_v23 }
 0x1f2   : > { %v1142_v48 = vadd.f32 %v1126_v2, %v1094_v46  ;;  %1180 = vst [vmem:[%s2233_s12 + $0x20] sm:$0xff] %v1164_v6  ;;  %1627 = vpow2.f32 %v1033_v44  ;;  %v1079_v10 = vmul.f32 %v1612_v28, %v2238_v49  ;;  %v1111_v13 = vmul.f32 %v1612_v28, %v2240_v16  ;;  %v880_v57 = vpop.xlane.xlu1 %879  ;;  %v926_v60 = vpop.xlane.xlu0 %925 }
 0x1f3   : > { %v2290_v51 = vpop.eup %1613  ;;  %1629 = vrcp.f32 %v1050_v52  ;;  %v987_v35 = vmul.f32 1.442695, %v958_v63  ;;  %v1035_v18 = vmul.f32 1.442695, %v1006_v54  ;;  %v943_v29 = vmax.f32 %v878_v19, %v926_v60 }
 0x1f4   : > { %v2292_v47 = vpop.eup %1615  ;;  %v1165_v61 = vadd.f32 %v2219_v58, %v1142_v48  ;;  %v790_v5 = vadd.f32 %v2119_v34, %v2160_v25  ;;  %v1095_v49 = vmul.f32 %v1079_v10, %v2188_v22  ;;  %v1127_v32 = vmul.f32 %v1111_v13, %v785_v53 }
 0x1f5   : > { %v1618_v16 = vpop.eup %1617  ;;  %v1051_v9 = vadd.f32 %v2292_v47, %v2290_v51  ;;  %1631 = vpow2.f32 %v987_v35  ;;  %v959_v27 = vsub.f32 %v878_v19, %v943_v29  ;;  %v1007_v31 = vsub.f32 %v926_v60, %v943_v29 }
 0x1f6   : > { %1181 = vst [vmem:[%s2233_s12 + $0x28] sm:$0xff] %v1165_v61  ;;  %v1080_v11 = vmul.f32 %v1618_v16, %v2251_v33  ;;  %v1112_v12 = vmul.f32 %v1618_v16, %v2253_v21  ;;  %1633 = vpow2.f32 %v1035_v18  ;;  %v1143_v14 = vadd.f32 %v1127_v32, %v1095_v49  ;;  %v928_v7 = vpop.xlane.xlu1 %927 }
 0x1f7   : > { %v2303_v56 = vpop.eup %1619  ;;  %1635 = vrcp.f32 %v1051_v9  ;;  %v989_v34 = vmul.f32 1.442695, %v959_v27  ;;  %v1037_v22 = vmul.f32 1.442695, %v1007_v31  ;;  %v944_v1 = vmax.f32 %v880_v57, %v928_v7 }
 0x1f8   : > { %v1622_v4 = vpop.eup %1621  ;;  %v1096_v44 = vmul.f32 %v1080_v11, %v2197_v40  ;;  %v1128_v19 = vmul.f32 %v1112_v12, %v790_v5  ;;  %v1166_v23 = vadd.f32 %v2219_v58, %v1143_v14  ;;  %v795_v33 = vadd.f32 %v2125_v37, %v2160_v25 }
 0x1f9   : > { %v1624_v21 = vpop.eup %1623  ;;  %v1052_v46 = vadd.f32 %v1622_v4, %v2303_v56  ;;  %1637 = vpow2.f32 %v989_v34  ;;  %v960_v2 = vsub.f32 %v880_v57, %v944_v1  ;;  %v1008_v6 = vsub.f32 %v928_v7, %v944_v1 }
 0x1fa   : > { %v1144_v53 = vadd.f32 %v1128_v19, %v1096_v44  ;;  %1182 = vst [vmem:[%s2233_s12 + $0x30] sm:$0xff] %v1166_v23  ;;  %1639 = vpow2.f32 %v1037_v22  ;;  %v1081_v28 = vmul.f32 %v1624_v21, %v2264_v62  ;;  %v1113_v40 = vmul.f32 %v1624_v21, %v2266_v24 }
 0x1fb   : > { %v1626_v52 = vpop.eup %1625  ;;  %1641 = vrcp.f32 %v1052_v46  ;;  %v991_v63 = vmul.f32 1.442695, %v960_v2  ;;  %v1039_v54 = vmul.f32 1.442695, %v1008_v6  ;;  %v800_v10 = vadd.f32 %v2123_v36, %v2160_v25 }
 0x1fc   : > { %v1628_v48 = vpop.eup %1627  ;;  %v1167_v37 = vadd.f32 %v2219_v58, %v1144_v53  ;;  %v1097_v13 = vmul.f32 %v1081_v28, %v2206_v17  ;;  %v1129_v57 = vmul.f32 %v1113_v40, %v795_v33  ;;  %v650_v35 = vadd.f32 %v2075_v20, %v2148_v8 }
 0x1fd   : > { %v1630_v60 = vpop.eup %1629  ;;  %v1053_v62 = vadd.f32 %v1628_v48, %v1626_v52  ;;  %1643 = vpow2.f32 %v991_v63  ;;  %v805_v20 = vadd.f32 %v2129_v39, %v2160_v25  ;;  %v810_v39 = vadd.f32 %v2127_v38, %v2160_v25 }
 0x1fe   : > { %1183 = vst [vmem:[%s2233_s12 + $0x38] sm:$0xff] %v1167_v37  ;;  %v1082_v24 = vmul.f32 %v1630_v60, %v2277_v50  ;;  %v1114_v18 = vmul.f32 %v1630_v60, %v2279_v59  ;;  %1645 = vpow2.f32 %v1039_v54  ;;  %v1145_v29 = vadd.f32 %v1129_v57, %v1097_v13 }
 0x1ff   : > { %v1632_v61 = vpop.eup %1631  ;;  %1647 = vrcp.f32 %v1053_v62  ;;  %v656_v50 = vadd.f32 %v2080_v30, %v2148_v8  ;;  %v662_v30 = vadd.f32 %v2085_v41, %v2148_v8  ;;  %v815_v21 = vadd.f32 %v2133_v43, %v2160_v25 }
 0x200   : > { %v1634_v36 = vpop.eup %1633  ;;  %v1098_v5 = vmul.f32 %v1082_v24, %v650_v35  ;;  %v1130_v17 = vmul.f32 %v1114_v18, %v800_v10  ;;  %v1168_v49 = vadd.f32 %v2219_v58, %v1145_v29  ;;  %v668_v41 = vadd.f32 %v2090_v55, %v2148_v8 }
 0x201   : > { %v1636_v32 = vpop.eup %1635  ;;  %v1054_v16 = vadd.f32 %v1634_v36, %v1632_v61  ;;  %v820_v28 = vadd.f32 %v2131_v42, %v2160_v25  ;;  %v674_v43 = vadd.f32 %v2095_v3, %v2148_v8  ;;  %v825_v57 = vadd.f32 %v2137_v45, %v2160_v25 }
 0x202   : > { %v1146_v9 = vadd.f32 %v1130_v17, %v1098_v5  ;;  %1184 = vst [vmem:[%s2233_s12 + $0x40] sm:$0xff] %v1168_v49  ;;  %v1083_v59 = vmul.f32 %v1636_v32, %v2290_v51  ;;  %v1115_v27 = vmul.f32 %v1636_v32, %v2292_v47  ;;  %v680_v60 = vadd.f32 %v2100_v15, %v2148_v8 }
 0x203   : > { %v1638_v31 = vpop.eup %1637  ;;  %1649 = vrcp.f32 %v1054_v16  ;;  %v830_v18 = vadd.f32 %v2135_v0, %v2160_v25  ;;  %v686_v45 = vadd.f32 %v2105_v26, %v2148_v8 }
 0x204   : > { %v1640_v11 = vpop.eup %1639  ;;  %v1169_v12 = vadd.f32 %v2219_v58, %v1146_v9  ;;  %v1099_v14 = vmul.f32 %v1083_v59, %v656_v50  ;;  %v1131_v7 = vmul.f32 %v1115_v27, %v805_v20 }
 0x205   : > { %v1642_v34 = vpop.eup %1641  ;;  %v1055_v22 = vadd.f32 %v1640_v11, %v1638_v31 }
 0x206   : > { %1185 = vst [vmem:[%s2233_s12 + $0x48] sm:$0xff] %v1169_v12  ;;  %v1084_v51 = vmul.f32 %v1642_v34, %v2303_v56  ;;  %v1116_v47 = vmul.f32 %v1642_v34, %v1622_v4  ;;  %v1147_v1 = vadd.f32 %v1131_v7, %v1099_v14 }
 0x207   : > { %v1644_v44 = vpop.eup %1643  ;;  %1651 = vrcp.f32 %v1055_v22 }
 0x208   : > { %v1646_v19 = vpop.eup %1645  ;;  %v1100_v23 = vmul.f32 %v1084_v51, %v662_v30  ;;  %v1132_v33 = vmul.f32 %v1116_v47, %v810_v39  ;;  %v1170_v38 = vadd.f32 %v2219_v58, %v1147_v1 }
 0x209   : > { %v1648_v46 = vpop.eup %1647  ;;  %v1056_v2 = vadd.f32 %v1646_v19, %v1644_v44 }
 0x20a   : > { %v1148_v6 = vadd.f32 %v1132_v33, %v1100_v23  ;;  %1186 = vst [vmem:[%s2233_s12 + $0x50] sm:$0xff] %v1170_v38  ;;  %v1085_v56 = vmul.f32 %v1648_v46, %v1626_v52  ;;  %v1117_v4 = vmul.f32 %v1648_v46, %v1628_v48 }
 0x20b   : > { %1653 = vrcp.f32 %v1056_v2 }
 0x20c   : > { %v1171_v53 = vadd.f32 %v2219_v58, %v1148_v6  ;;  %v1101_v40 = vmul.f32 %v1085_v56, %v668_v41  ;;  %v1133_v63 = vmul.f32 %v1117_v4, %v815_v21 }
 0x20d   : > { %v1650_v54 = vpop.eup %1649 }
 0x20e   : > { %1187 = vst [vmem:[%s2233_s12 + $0x58] sm:$0xff] %v1171_v53  ;;  %v1086_v37 = vmul.f32 %v1650_v54, %v1632_v61  ;;  %v1118_v55 = vmul.f32 %v1650_v54, %v1634_v36  ;;  %v1149_v10 = vadd.f32 %v1133_v63, %v1101_v40 }
 0x210   : > { %v1102_v13 = vmul.f32 %v1086_v37, %v674_v43  ;;  %v1134_v52 = vmul.f32 %v1118_v55, %v820_v28  ;;  %v1172_v48 = vadd.f32 %v2219_v58, %v1149_v10 }
 0x211   : > { %v1652_v42 = vpop.eup %1651 }
 0x212   : > { %v1150_v35 = vadd.f32 %v1134_v52, %v1102_v13  ;;  %1188 = vst [vmem:[%s2233_s12 + $0x60] sm:$0xff] %v1172_v48  ;;  %v1087_v3 = vmul.f32 %v1652_v42, %v1638_v31  ;;  %v1119_v62 = vmul.f32 %v1652_v42, %v1640_v11 }
 0x214   : > { %v1173_v24 = vadd.f32 %v2219_v58, %v1150_v35  ;;  %v1103_v29 = vmul.f32 %v1087_v3, %v680_v60  ;;  %v1135_v61 = vmul.f32 %v1119_v62, %v825_v57 }
 0x215   : > { %v1654_v36 = vpop.eup %1653 }
 0x216   : > { %1189 = vst [vmem:[%s2233_s12 + $0x68] sm:$0xff] %v1173_v24  ;;  %v1088_v15 = vmul.f32 %v1654_v36, %v1644_v44  ;;  %v1120_v5 = vmul.f32 %v1654_v36, %v1646_v19  ;;  %v1151_v17 = vadd.f32 %v1135_v61, %v1103_v29 }
 0x218   : > { %v1104_v49 = vmul.f32 %v1088_v15, %v686_v45  ;;  %v1136_v20 = vmul.f32 %v1120_v5, %v830_v18  ;;  %v1174_v32 = vadd.f32 %v2219_v58, %v1151_v17 }
 0x21a   : > { %v1152_v0 = vadd.f32 %v1136_v20, %v1104_v49  ;;  %1190 = vst [vmem:[%s2233_s12 + $0x70] sm:$0xff] %v1174_v32 }
 0x21c   : > { %v1175_v26 = vadd.f32 %v2219_v58, %v1152_v0 }
 0x21e   : > { %1191 = vst [vmem:[%s2233_s12 + $0x78] sm:$0xff] %v1175_v26 }
 0x21f   : > { %1696 = shalt.err (!%p1693_p7)
}
 0x220   : > { %s1697_s5 = scalar_lea.hbm %s2368_s23, 2048  ;;  %s1701_s8 = scalar_lea.hbm %s2421_s4, 4096 }
 0x221   : > { %p1698_p8 = scmp.ne.s32.totalorder %s2368_s23, %s1697_s5  ;;  %p1702_p1 = scmp.lt.u32.totalorder %s2368_s23, %s2421_s4 }
 0x222   : > { %p1703_p0 = scmp.lt.u32.totalorder %s1701_s8, %s1697_s5  ;;  %p1705_p6 = scmp.lt.u32.totalorder %s1697_s5, %s2368_s23 }
 0x223   : > { %p1699_p11 = pnand %p1698_p8, %p2433_p9 }
 0x224   : > { %p1704_p5 = por %p1703_p0, %p1702_p1 }
 0x225   : > { %p1700_p13 = pneg %p1699_p11 }
 0x226   : > { %p1706_p10 = por %p1705_p6, %p1704_p5 }
 0x228   : > { %p1707_p12 = pnand %p1706_p10, %p1700_p13 }
 0x22a   : > { %1710 = shalt.err (!%p1707_p12)
}
 0x22b   : > { %s1756_s11 = smov 128   ;;  %s1757_s12 = smov 8  }
 0x22c   : > { %1508 = dma.vmem_to_hbm [thread:$0]  (%p2433_p9), %s2370_s14, 2048, %s2368_s23, %s2376_s27, %s1756_s11, %s1756_s11, %s1757_s12  }
 0x22d PF: > { %p1520_p2 = scmp.ge.s32.totalorder %s1749_s18, 2  ;;  %s1221_s13 = sand.u32 1, %s1737_s15  }
 0x22e   : > { %p2434_p3 = scmp.ne.s32.totalorder %s2426_s26, 0  ;;  %s1222_s20 = scalar_lea.sflag [#allocation4], %s1221_s13 }
 0x230   : > { %p1515_p4 = pnand %p1520_p2, %p2434_p3 }
 0x232   : > { %1732 = dma.done.wait (!%p1515_p4), %s1222_s20, 2048  }
 0x233   : > { %1734 = vsyncadd (!%p1515_p4), %s1222_s20, 4294965248  ;;  %p15_p7 = scmp.ge.s32.totalorder %s1808_s21, 4   ;;  %s2435_s15 = smov %s1741_s16 }
 0x234   : > { %s2436_s16 = smov %s1745_s17  ;;  %s2437_s17 = smov %s1819_s24 }
 0x235   : > { %s2438_s18 = smov %s1808_s21  ;;  %17 = sbr.rel (!%p15_p7) target bundleno = 4 (0x4), region = 76 }
 0x23c   :  { %1227 = vsyncpa [#allocation3], 1 }
 0x23d   :  { %1229 = vsyncpa [#allocation3 + $0x1], 1 }
 0x23e   :  { %1230 = vsyncpa [#allocation4], 1 }
 0x23f   :  { %1232 = vsyncpa [#allocation4 + $0x1], 1 }

</bundles_post_ra>
